<compile_context>
chip_gen: v7x
topology: tpu7x:2x2x1
jax: 0.10.0
libtpu: 0.0.40
codegen_flags: <defaults>
</compile_context>

<pallas_src>
import math

import jax
import jax.numpy as jnp
import numpy as np
from jax.experimental import pallas as pl
from jax.experimental.pallas import tpu as pltpu

_LANE = 128


def _round_up(a, b):
    return ((a + b - 1) // b) * b


def _upconv_gemm_kernel(x_ref, w_ref, b_ref, o_ref):
    # x_ref: (K, tm) lane-dense input tile, w_ref: (NOUT, K), b_ref: (NOUT, 1).
    acc = jnp.dot(w_ref[...], x_ref[...], preferred_element_type=jnp.float32)
    o_ref[...] = (acc + b_ref[...]).astype(o_ref.dtype)


def upsample_conv(x, weight, bias, *, tm_max=1024, out_dtype=None):
    """ConvTranspose3d(in_ch, out_ch, kernel_size=2, stride=2) forward.

    x:      (N, C_in, D, H, W)        -- NCDHW, like PyTorch
    weight: (C_in, C_out, 2, 2, 2)    -- PyTorch ConvTranspose3d weight layout
    bias:   (C_out,)
    returns (N, C_out, 2D, 2H, 2W)
    """
    N, Cin, D, H, W = x.shape
    Cin_w, Cout, kD, kH, kW = weight.shape
    assert (kD, kH, kW) == (2, 2, 2) and Cin_w == Cin

    out_dtype = x.dtype if out_dtype is None else out_dtype
    M = N * D * H * W
    K = Cin
    NOUT = Cout * 8

    # ---- choose the spatial row tile (lane axis of both loads and stores) -------
    in_item = jnp.dtype(x.dtype).itemsize
    out_item = jnp.dtype(out_dtype).itemsize
    Mp_min = _round_up(M, _LANE)

    # Cap tm so the double-buffered (K,tm) + (NOUT,tm) blocks stay well inside VMEM
    # on every generation (v7x has only 64 MiB physical).
    blk_bytes_per_row = 2 * (K * in_item + NOUT * out_item)
    tm_budget = max(_LANE, ((40 << 20) // blk_bytes_per_row) // _LANE * _LANE)
    tm_cap = max(_LANE, min((tm_max // _LANE) * _LANE, tm_budget))

    # Prefer >= 2 grid steps so the "parallel" axis can shard across v7x's 2 TCs.
    grid_m = max(pl.cdiv(Mp_min, tm_cap), 2 if Mp_min >= 2 * _LANE else 1)
    tm = _round_up(pl.cdiv(Mp_min, grid_m), _LANE)
    grid_m = pl.cdiv(Mp_min, tm)
    Mp = grid_m * tm

    # ---- GEMM view of input / weight / bias (coarse block-contiguous prep) ------
    # columns:  m = n*D*H*W + d*H*W + h*W + w
    x_km = jnp.transpose(x.reshape(N, Cin, D * H * W), (1, 0, 2)).reshape(Cin, M)
    if Mp != M:
        x_km = jnp.pad(x_km, ((0, 0), (0, Mp - M)))
    # rows:     r = co*8 + kd*4 + kh*2 + kw
    w_nk = jnp.transpose(weight.reshape(Cin, NOUT), (1, 0))
    b_col = jnp.repeat(bias, 8).reshape(NOUT, 1).astype(jnp.float32)

    # ---- VMEM budget / cost estimate --------------------------------------------
    need_bytes = tm * blk_bytes_per_row + (NOUT * K + NOUT) * 4 + (1 << 20)
    cp_kwargs = dict(dimension_semantics=("parallel",))
    if need_bytes > (12 << 20):
        cp_kwargs["vmem_limit_bytes"] = int(min(need_bytes + (8 << 20), 48 << 20))
    compiler_params = pltpu.CompilerParams(**cp_kwargs)

    cost = pl.CostEstimate(
        flops=2 * M * K * NOUT,
        transcendentals=0,
        bytes_accessed=(M * K * in_item + NOUT * K * in_item + NOUT * 4
                        + M * NOUT * out_item),
    )

    y2d = pl.pallas_call(
        _upconv_gemm_kernel,
        out_shape=jax.ShapeDtypeStruct((NOUT, Mp), out_dtype),
        grid=(grid_m,),
        in_specs=[
            pl.BlockSpec((K, tm), lambda i: (0, i)),      # lane-dense spatial tile
            pl.BlockSpec((NOUT, K), lambda i: (0, 0)),    # weight resident
            pl.BlockSpec((NOUT, 1), lambda i: (0, 0)),    # bias resident
        ],
        out_specs=pl.BlockSpec((NOUT, tm), lambda i: (0, i)),  # lane-dense stores
        compiler_params=compiler_params,
        cost_estimate=cost,
    )(x_km, w_nk, b_col)

    if Mp != M:
        y2d = y2d[:, :M]

    # Scatter the 8 kernel taps back into the 2x-upsampled spatial grid.
    # TODO(synk): this XLA transpose re-reads/re-writes the (8x larger) output once more;
    # fusing the kh/kw pair-interleave into the kernel (so it could store a
    # (1, Cout, 2, 2H, 2W) block of the final layout directly) would remove that HBM
    # round-trip but requires in-kernel lane/sublane relayouts that are not safe to
    # commit untested.
    y = y2d.reshape(Cout, 2, 2, 2, N, D, H, W)
    y = jnp.transpose(y, (4, 0, 5, 1, 6, 2, 7, 3))   # (N, Cout, D, 2, H, 2, W, 2)
    return y.reshape(N, Cout, 2 * D, 2 * H, 2 * W)


def init_params(key, in_channels, out_channels, dtype=jnp.float32):
    """Deterministic init mimicking init_linear(relu=True): kaiming_uniform(fan_in, relu)
    for the weight; a small uniform bias (nonzero so the bias path is exercised)."""
    k_w, k_b = jax.random.split(key)
    fan_in = out_channels * 8  # PyTorch fan_in for ConvTranspose3d weight (Cin,Cout,2,2,2)
    bound = math.sqrt(3.0) * math.sqrt(2.0) / math.sqrt(fan_in)
    weight = jax.random.uniform(
        k_w, (in_channels, out_channels, 2, 2, 2), dtype, minval=-bound, maxval=bound)
    bias = jax.random.uniform(k_b, (out_channels,), dtype, minval=-0.1, maxval=0.1)
    return weight, bias


def reference_upsample_conv(x, weight, bias):
    # Independent pure-JAX reference: explicit tap placement via einsum.
    y8 = jnp.einsum('ncdhw,coijk->nodihjwk', x, weight)
    N, Cout = x.shape[0], weight.shape[1]
    D, H, W = x.shape[2], x.shape[3], x.shape[4]
    y = y8.reshape(N, Cout, 2 * D, 2 * H, 2 * W)
    return y + bias[None, :, None, None, None]


if __name__ == "__main__":
    key = jax.random.PRNGKey(0)
    k_x, k_p, k_x2, k_p2 = jax.random.split(key, 4)

    # Main check: M = 2*8*8*8 = 1024 -> tm = 512, grid = 2 ("parallel", v7x-friendly).
    N, Cin, Cout = 2, 4, 8
    D = H = W = 8
    x = jax.random.normal(k_x, (N, Cin, D, H, W), jnp.float32)
    weight, bias = init_params(k_p, Cin, Cout)

    y = jax.block_until_ready(upsample_conv(x, weight, bias))
    assert y.shape == (N, Cout, 2 * D, 2 * H, 2 * W), y.shape
    y_ref = reference_upsample_conv(x, weight, bias)
    np.testing.assert_allclose(np.asarray(y), np.asarray(y_ref), rtol=1e-5, atol=1e-5)

    # Ragged check: N*D*H*W = 210 not a multiple of the tile (exercises the padding path).
    N2, Cin2, Cout2 = 1, 3, 5
    D2, H2, W2 = 5, 6, 7
    x2 = jax.random.normal(k_x2, (N2, Cin2, D2, H2, W2), jnp.float32)
    weight2, bias2 = init_params(k_p2, Cin2, Cout2)
    y2 = jax.block_until_ready(upsample_conv(x2, weight2, bias2))
    assert y2.shape == (N2, Cout2, 2 * D2, 2 * H2, 2 * W2), y2.shape
    y2_ref = reference_upsample_conv(x2, weight2, bias2)
    np.testing.assert_allclose(np.asarray(y2), np.asarray(y2_ref), rtol=1e-5, atol=1e-5)

    print("KERNEL_OK")
</pallas_src>

<mosaic_0001>
module attributes {stable_mosaic.version = 11 : i64} {
  func.func @_upconv_gemm_kernel(%arg0: i32, %arg1: memref<4x512xf32, #tpu.memory_space<vmem>>, %arg2: memref<64x4xf32, #tpu.memory_space<vmem>>, %arg3: memref<64x1xf32, #tpu.memory_space<vmem>>, %arg4: memref<64x512xf32, #tpu.memory_space<vmem>>) attributes {dimension_semantics = [#tpu.dimension_semantics<parallel>], iteration_bounds = array<i64: 2>, scalar_prefetch = 0 : i64, scratch_operands = 0 : i64, tpu.core_type = #tpu.core_type<tc>, window_params = [{transform_indices = @transform_0, window_bounds = array<i64: 4, 512>}, {pipeline_mode = #tpu.pipeline_mode<synchronous>, transform_indices = @transform_1, window_bounds = array<i64: 64, 4>}, {pipeline_mode = #tpu.pipeline_mode<synchronous>, transform_indices = @transform_2, window_bounds = array<i64: 64, 1>}, {transform_indices = @transform_3, window_bounds = array<i64: 64, 512>}]} {
    %c0 = arith.constant 0 : index
    %c0_0 = arith.constant 0 : index
    %0 = vector.load %arg2[%c0, %c0_0] : memref<64x4xf32, #tpu.memory_space<vmem>>, vector<64x4xf32>
    %c0_1 = arith.constant 0 : index
    %c0_2 = arith.constant 0 : index
    %1 = vector.load %arg1[%c0_1, %c0_2] : memref<4x512xf32, #tpu.memory_space<vmem>>, vector<4x512xf32>
    %cst = arith.constant dense<0.000000e+00> : vector<64x512xf32>
    %2 = tpu.matmul %0, %1, %cst {dimension_numbers = #tpu.dot_dimension_numbers<[1], [0], [0], [1], [0, 0, 1, 1], [], []>} : vector<64x4xf32>, vector<4x512xf32>, vector<64x512xf32> -> vector<64x512xf32>
    %c0_3 = arith.constant 0 : index
    %c0_4 = arith.constant 0 : index
    %3 = vector.load %arg3[%c0_3, %c0_4] : memref<64x1xf32, #tpu.memory_space<vmem>>, vector<64x1xf32>
    %4 = vector.broadcast %3 : vector<64x1xf32> to vector<64x512xf32>
    %5 = arith.addf %2, %4 : vector<64x512xf32>
    %c0_5 = arith.constant 0 : index
    %c0_6 = arith.constant 0 : index
    %6 = vector.load %arg4[%c0_5, %c0_6] : memref<64x512xf32, #tpu.memory_space<vmem>>, vector<64x512xf32>
    tpu.vector_store %arg4[%c0_5, %c0_6], %5 {strides = array<i32>} : memref<64x512xf32, #tpu.memory_space<vmem>>, vector<64x512xf32>,
    return
  }
  func.func @transform_0(%arg0: i32) -> (i32, i32) {
    %c0_i32 = arith.constant 0 : i32
    %c0_i32_0 = arith.constant 0 : i32
    return %c0_i32, %arg0 : i32, i32
  }
  func.func @transform_1(%arg0: i32) -> (i32, i32) {
    %c0_i32 = arith.constant 0 : i32
    %c0_i32_0 = arith.constant 0 : i32
    %c0_i32_1 = arith.constant 0 : i32
    return %c0_i32, %c0_i32_0 : i32, i32
  }
  func.func @transform_2(%arg0: i32) -> (i32, i32) {
    %c0_i32 = arith.constant 0 : i32
    %c0_i32_0 = arith.constant 0 : i32
    %c0_i32_1 = arith.constant 0 : i32
    return %c0_i32, %c0_i32_0 : i32, i32
  }
  func.func @transform_3(%arg0: i32) -> (i32, i32) {
    %c0_i32 = arith.constant 0 : i32
    %c0_i32_0 = arith.constant 0 : i32
    return %c0_i32, %arg0 : i32, i32
  }
}

</mosaic_0001>

<bundles_post_ra>
// kernel: tpu_custom_call.1
= control target key start
LH: loop header
LB: loop body
LE: loop exit
PB: predicated region body
PF: predicated region fallthrough
CT: control target
= control target key end

     0   :  { %8 = vsyncpa [#allocation3], 0  ;;  %s994_s0 = inlined_call_operand.vmem [shape: f32[4,1024], index: 0, kind: input, shape index: {}]   ;;  %s995_s1 = inlined_call_operand.vmem [shape: f32[64,4], index: 1, kind: input, shape index: {}]   ;;  %s996_s2 = inlined_call_operand.vmem [shape: f32[64,1], index: 2, kind: input, shape index: {}]   ;;  %s997_s3 = inlined_call_operand.hbm [shape: f32[64,1024], index: 3, kind: output, shape index: {}]  }
   0x1   :  { %10 = vsyncpa [#allocation3 + $0x1], 0  ;;  %s773_s12 = smov 0   ;;  %s775_s13 = smov 0  }
   0x2   :  { %s777_s14 = smov 0   ;;  %s779_s15 = smov 0  }
   0x3 LB: > { %s794_s16 = sadd.s32 4294967295, %s745_s15   ;;  %s602_s17 = sadd.s32 4294967294, %s745_s15   ;;  %s745_s15 = sphi %s779_s15, %s1003_s15   ;;  %s741_s14 = sphi %s777_s14, %s1002_s14   ;;  %s737_s13 = sphi %s775_s13, %s1001_s13   ;;  %s733_s12 = sphi %s773_s12, %s1000_s12  }
   0x4   : > { %s798_s18 = sadd.s32 1, %s745_s15   ;;  %s91_s19 = sadd.s32 1, %s741_s14 }
   0x5   : > { %s88_s20 = ssub.s32 %s745_s15, %s798_s18  ;;  %p101_p0 = scmp.ne.s32.totalorder %s741_s14, %s737_s13 }
   0x6   : > { %p89_p1 = scmp.eq.s32.totalorder %s88_s20, 0  ;;  %p102_p2 = scmp.eq.s32.totalorder %s794_s16, 1 }
   0x7   : > { %p107_p3 = scmp.ne.s32.totalorder %s737_s13, %s733_s12  ;;  %p108_p4 = scmp.eq.s32.totalorder %s602_s17, 1 }
   0x8   : > { %s809_s21 = scalar_select %p89_p1, %s741_s14, %s91_s19  }
   0x9   : > { %p811_p5 = por %p102_p2, %p101_p0  ;;  %p815_p6 = por %p108_p4, %p107_p3 }
   0xa   : > { %p605_p7 = scmp.ge.s32.totalorder %s745_s15, 1  ;;  %p141_p8 = scmp.lt.s32.totalorder %s745_s15, 3 }
   0xc   : > { %p142_p9 = pnand %p605_p7, %p141_p8 }
   0xd   : > { %s607_s24 = sshll.u32 (!%p142_p9), %s794_s16, 2  ;;  %v747_v0 = vmov (!%p142_p9), 0.0   ;;  %v748_v1 = vmov (!%p142_p9), 0   ;;  %v182_v2 = vld [vmem:[%s996_s2] sm:$0xff] (!%p142_p9)  ;;  %v184_v3 = vld [vmem:[%s996_s2 + $0x10] sm:$0xff] (!%p142_p9)  ;;  %v183_v4 = vld [vmem:[%s996_s2 + $0x8] sm:$0xff] (!%p142_p9) }
   0xe   : > { %145 = sbr.rel (%p142_p9) target bundleno = 288 (0x120), region = 32  ;;  %p166_p10 = scmp.lt.s32.totalorder (!%p142_p9), %s607_s24, 7  ;;  %332 = vmatprep.mubr.f32.mxu0 (!%p142_p9), %v747_v0  ;;  %445 = vmatprep.mubr.f32.mxu1 (!%p142_p9), %v747_v0  ;;  %v185_v5 = vld [vmem:[%s996_s2 + $0x18] sm:$0xff] (!%p142_p9)  ;;  %vm259_vm0 = vcmask (!%p142_p9), 1043456   ;;  %v172_v10 = vld [vmem:[%s995_s1] sm:$0xff] (!%p142_p9)  ;;  %vm234_vm1 = vcmask (!%p142_p9), 31744  }
   0xf   : > { %679 = vset.pattern.permute.xlu0 (!%p142_p9), %v748_v1  ;;  %680 = vset.pattern.permute.xlu1 (!%p142_p9), %v748_v1  ;;  %v187_v11 = vld [vmem:[%s996_s2 + $0x28] sm:$0xff] (!%p142_p9)  ;;  %v186_v12 = vld [vmem:[%s996_s2 + $0x20] sm:$0xff] (!%p142_p9)  ;;  %v189_v14 = vld [vmem:[%s996_s2 + $0x38] sm:$0xff] (!%p142_p9)  ;;  %s162_s25 = sand.u32 (!%p142_p9), 1, %s737_s13   ;;  %s634_s28 = sshll.u32 (!%p142_p9), %s794_s16, 9 }
  0x10   : > { %192 = vperm.xlu0 (!%p142_p9), %679, %v182_v2   ;;  %202 = vperm.xlu1 (!%p142_p9), %680, %v184_v3   ;;  %v173_v13 = vld [vmem:[%s995_s1 + $0x8] sm:$0xff] (!%p142_p9)  ;;  %v188_v15 = vld [vmem:[%s996_s2 + $0x30] sm:$0xff] (!%p142_p9)  ;;  %v175_v17 = vld [vmem:[%s995_s1 + $0x18] sm:$0xff] (!%p142_p9)  ;;  %s606_s26 = sshll.u32 (!%p142_p9), %s162_s25, 8  ;;  %s943_s16 = scalar_lea.hbm (!%p142_p9), %s997_s3, %s634_s28 }
  0x11   : > { %v174_v16 = vld [vmem:[%s995_s1 + $0x10] sm:$0xff] (!%p142_p9)  ;;  %v176_v18 = vld [vmem:[%s995_s1 + $0x20] sm:$0xff] (!%p142_p9)  ;;  %v177_v19 = vld [vmem:[%s995_s1 + $0x28] sm:$0xff] (!%p142_p9)  ;;  %s908_s27 = scalar_lea.vmem (!%p142_p9), [#allocation2], %s606_s26  ;;  %s953_s5 = scalar_lea.sflag (!%p142_p9), [#allocation3], %s162_s25 }
  0x12   : > { %v178_v20 = vld [vmem:[%s995_s1 + $0x30] sm:$0xff] (!%p142_p9)  ;;  %v179_v21 = vld [vmem:[%s995_s1 + $0x38] sm:$0xff] (!%p142_p9)  ;;  %s749_s7 = smov (!%p142_p9), [#allocation2]  }
  0x13   : > { %s687_s8 = sshll.u32 (!%p142_p9), %s749_s7, 4  ;;  %s688_s8 = int_to_ptr.vmem [resolvable:$false] %s687_s8 }
  0x14   : > { %197 = vperm.xlu0 (!%p142_p9), %679, %v183_v4   ;;  %207 = vperm.xlu1 (!%p142_p9), %680, %v185_v5  }
  0x15   : > { %s1005_s24 = smov (!%p166_p10, %s607_s24), 7 }
  0x16   : > { %s608_s29 = sshll.u32 %s1005_s24, 2 }
  0x17   : > { %s169_s9 = scalar_lea.vmem %s994_s0, %s608_s29  ;;  %s540_s29 = sshll.u32 %s908_s27, 4  ;;  %s945_s29 = int_to_ptr.vmem [resolvable:$true] %s540_s29 }
  0x18   : > { %v180_v6 = vld [vmem:[%s169_s9] sm:$0xff]  ;;  %v181_v7 = vld [vmem:[%s169_s9 + $0x8] sm:$0xff]  ;;  %217 = vperm.xlu1 %680, %v187_v11   ;;  %212 = vperm.xlu0 %679, %v186_v12   ;;  %s683_s6 = scalar_lea.vmem %s945_s29, 4096  ;;  %s689_s9 = scalar_lea.vmem %s688_s8, 8192 }
  0x19   : > { %v232_v8 = vcombine.high %v180_v6, %v180_v6  ;;  %v233_v9 = vcombine.high %v181_v7, %v181_v7  ;;  %p684_p11 = scmp.ne.s32.totalorder %s945_s29, %s683_s6  ;;  %p690_p0 = scmp.lt.s32.totalorder %s945_s29, %s688_s8 }
  0x1a   : > { %p691_p1 = scmp.lt.s32.totalorder %s689_s9, %s683_s6 }
  0x1b   : > { %609 = vmatprep.subr.msk.mxu0 %vm259_vm0, %v232_v8  ;;  %619 = vmatprep.subr.msk.mxu1 %vm259_vm0, %v233_v9  ;;  %p685_p12 = pnand %p684_p11, %p811_p5 }
  0x1c   : > { %610 = vmatpush1.msk.msra.mxu0 %vm259_vm0, %v180_v6  ;;  %620 = vmatpush1.msk.msra.mxu1 %vm259_vm0, %v181_v7  ;;  %p692_p2 = por %p691_p1, %p690_p0 }
  0x1d   : > { %611 = vmatmul.mubr.msk.f32.vlgmr.msra.gmra.mrb[0].mxu0 %vm234_vm1, %v172_v10  ;;  %621 = vmatmul.mubr.msk.f32.vlgmr.msra.gmra.mrb[0].mxu1 %vm234_vm1, %v172_v10  ;;  %p686_p13 = pneg %p685_p12 }
  0x1e   : > { %338 = vmatprep.mubr.f32.mxu0 %v747_v0  ;;  %451 = vmatprep.mubr.f32.mxu1 %v747_v0 }
  0x1f   : > { %227 = vperm.xlu1 %680, %v189_v14   ;;  %222 = vperm.xlu0 %679, %v188_v15   ;;  %p693_p3 = pnand %p692_p2, %p686_p13 }
  0x21   : > { %612 = vmatmul.mubr.msk.f32.gmra.mrb[2].mxu0 %vm234_vm1, %v173_v13  ;;  %622 = vmatmul.mubr.msk.f32.gmra.mrb[2].mxu1 %vm234_vm1, %v173_v13 }
  0x22   : > { %344 = vmatprep.mubr.f32.mxu0 %v747_v0  ;;  %457 = vmatprep.mubr.f32.mxu1 %v747_v0 }
  0x25   : > { %613 = vmatmul.mubr.msk.f32.gmra.mrb[4].mxu0 %vm234_vm1, %v174_v16  ;;  %623 = vmatmul.mubr.msk.f32.gmra.mrb[4].mxu1 %vm234_vm1, %v174_v16 }
  0x26   : > { %350 = vmatprep.mubr.f32.mxu0 %v747_v0  ;;  %463 = vmatprep.mubr.f32.mxu1 %v747_v0 }
  0x29   : > { %614 = vmatmul.mubr.msk.f32.gmra.mrb[6].mxu0 %vm234_vm1, %v175_v17  ;;  %624 = vmatmul.mubr.msk.f32.gmra.mrb[6].mxu1 %vm234_vm1, %v175_v17 }
  0x2a   : > { %356 = vmatprep.mubr.f32.mxu0 %v747_v0  ;;  %469 = vmatprep.mubr.f32.mxu1 %v747_v0 }
  0x2d   : > { %615 = vmatmul.mubr.msk.f32.gmra.mrb[8].mxu0 %vm234_vm1, %v176_v18  ;;  %625 = vmatmul.mubr.msk.f32.gmra.mrb[8].mxu1 %vm234_vm1, %v176_v18 }
  0x2e   : > { %362 = vmatprep.mubr.f32.mxu0 %v747_v0  ;;  %475 = vmatprep.mubr.f32.mxu1 %v747_v0 }
  0x31   : > { %616 = vmatmul.mubr.msk.f32.gmra.mrb[10].mxu0 %vm234_vm1, %v177_v19  ;;  %626 = vmatmul.mubr.msk.f32.gmra.mrb[10].mxu1 %vm234_vm1, %v177_v19 }
  0x32   : > { %368 = vmatprep.mubr.f32.mxu0 %v747_v0  ;;  %481 = vmatprep.mubr.f32.mxu1 %v747_v0 }
  0x35   : > { %617 = vmatmul.mubr.msk.f32.gmra.mrb[12].mxu0 %vm234_vm1, %v178_v20  ;;  %627 = vmatmul.mubr.msk.f32.gmra.mrb[12].mxu1 %vm234_vm1, %v178_v20 }
  0x36   : > { %374 = vmatprep.mubr.f32.mxu0 %v747_v0  ;;  %487 = vmatprep.mubr.f32.mxu1 %v747_v0 }
  0x39   : > { %618 = vmatmul.mubr.msk.f32.gmra.mrb[14].mxu0 %vm234_vm1, %v179_v21  ;;  %628 = vmatmul.mubr.msk.f32.gmra.mrb[14].mxu1 %vm234_vm1, %v179_v21 }
  0x8f   : > { %v193_v22 = vpop.permute.xlu0 %192  ;;  %v203_v32 = vpop.permute.xlu1 %202 }
  0x93   : > { %v198_v31 = vpop.permute.xlu0 %197  ;;  %v208_v49 = vpop.permute.xlu1 %207 }
  0x97   : > { %v213_v58 = vpop.permute.xlu0 %212  ;;  %v218_v3 = vpop.permute.xlu1 %217 }
  0x9e   : > { %v223_v12 = vpop.permute.xlu0 %222  ;;  %v228_v21 = vpop.permute.xlu1 %227 }
  0xf0   : > { %v334_v23 = vpop.f32.mrb[0].mxu0  ;;  %v447_v24 = vpop.f32.mrb[0].mxu1 }
  0xf1   : > { %v335_v25 = vadd.f32 %v334_v23, %v193_v22  ;;  %v448_v26 = vadd.f32 %v447_v24, %v193_v22  ;;  %v336_v27 = vpop.f32.mrb[1].mxu0  ;;  %v449_v28 = vpop.f32.mrb[1].mxu1 }
  0xf2   : > { %v337_v29 = vadd.f32 %v336_v27, %v193_v22  ;;  %v450_v30 = vadd.f32 %v449_v28, %v193_v22 }
  0xf3   : > { %494 = vst [vmem:[%s908_s27] sm:$0xff] %v335_v25  ;;  %496 = vst [vmem:[%s908_s27 + $0x10] sm:$0xff] %v448_v26 }
  0xf4   : > { %495 = vst [vmem:[%s908_s27 + $0x8] sm:$0xff] %v337_v29  ;;  %497 = vst [vmem:[%s908_s27 + $0x18] sm:$0xff] %v450_v30  ;;  %v340_v33 = vpop.f32.mrb[2].mxu0  ;;  %v453_v34 = vpop.f32.mrb[2].mxu1 }
  0xf5   : > { %v341_v35 = vadd.f32 %v340_v33, %v198_v31  ;;  %v454_v36 = vadd.f32 %v453_v34, %v198_v31  ;;  %v342_v37 = vpop.f32.mrb[3].mxu0  ;;  %v455_v38 = vpop.f32.mrb[3].mxu1 }
  0xf6   : > { %v343_v39 = vadd.f32 %v342_v37, %v198_v31  ;;  %v456_v40 = vadd.f32 %v455_v38, %v198_v31 }
  0xf7   : > { %498 = vst [vmem:[%s908_s27 + $0x20] sm:$0xff] %v341_v35  ;;  %500 = vst [vmem:[%s908_s27 + $0x30] sm:$0xff] %v454_v36 }
  0xf8   : > { %499 = vst [vmem:[%s908_s27 + $0x28] sm:$0xff] %v343_v39  ;;  %501 = vst [vmem:[%s908_s27 + $0x38] sm:$0xff] %v456_v40  ;;  %v346_v41 = vpop.f32.mrb[4].mxu0  ;;  %v459_v42 = vpop.f32.mrb[4].mxu1 }
  0xf9   : > { %v347_v43 = vadd.f32 %v346_v41, %v203_v32  ;;  %v460_v44 = vadd.f32 %v459_v42, %v203_v32  ;;  %v348_v45 = vpop.f32.mrb[5].mxu0  ;;  %v461_v46 = vpop.f32.mrb[5].mxu1 }
  0xfa   : > { %v349_v47 = vadd.f32 %v348_v45, %v203_v32  ;;  %v462_v48 = vadd.f32 %v461_v46, %v203_v32 }
  0xfb   : > { %502 = vst [vmem:[%s908_s27 + $0x40] sm:$0xff] %v347_v43  ;;  %504 = vst [vmem:[%s908_s27 + $0x50] sm:$0xff] %v460_v44 }
  0xfc   : > { %503 = vst [vmem:[%s908_s27 + $0x48] sm:$0xff] %v349_v47  ;;  %505 = vst [vmem:[%s908_s27 + $0x58] sm:$0xff] %v462_v48  ;;  %v352_v50 = vpop.f32.mrb[6].mxu0  ;;  %v465_v51 = vpop.f32.mrb[6].mxu1 }
  0xfd   : > { %v353_v52 = vadd.f32 %v352_v50, %v208_v49  ;;  %v466_v53 = vadd.f32 %v465_v51, %v208_v49  ;;  %v354_v54 = vpop.f32.mrb[7].mxu0  ;;  %v467_v55 = vpop.f32.mrb[7].mxu1 }
  0xfe   : > { %v355_v56 = vadd.f32 %v354_v54, %v208_v49  ;;  %v468_v57 = vadd.f32 %v467_v55, %v208_v49 }
  0xff   : > { %506 = vst [vmem:[%s908_s27 + $0x60] sm:$0xff] %v353_v52  ;;  %508 = vst [vmem:[%s908_s27 + $0x70] sm:$0xff] %v466_v53 }
 0x100   : > { %507 = vst [vmem:[%s908_s27 + $0x68] sm:$0xff] %v355_v56  ;;  %509 = vst [vmem:[%s908_s27 + $0x78] sm:$0xff] %v468_v57  ;;  %v358_v59 = vpop.f32.mrb[8].mxu0  ;;  %v471_v60 = vpop.f32.mrb[8].mxu1 }
 0x101   : > { %v359_v61 = vadd.f32 %v358_v59, %v213_v58  ;;  %v472_v62 = vadd.f32 %v471_v60, %v213_v58  ;;  %v360_v63 = vpop.f32.mrb[9].mxu0  ;;  %v473_v0 = vpop.f32.mrb[9].mxu1 }
 0x102   : > { %v361_v1 = vadd.f32 %v360_v63, %v213_v58  ;;  %v474_v2 = vadd.f32 %v473_v0, %v213_v58 }
 0x103   : > { %510 = vst [vmem:[%s908_s27 + $0x80] sm:$0xff] %v359_v61  ;;  %512 = vst [vmem:[%s908_s27 + $0x90] sm:$0xff] %v472_v62 }
 0x104   : > { %511 = vst [vmem:[%s908_s27 + $0x88] sm:$0xff] %v361_v1  ;;  %513 = vst [vmem:[%s908_s27 + $0x98] sm:$0xff] %v474_v2  ;;  %v364_v4 = vpop.f32.mrb[10].mxu0  ;;  %v477_v5 = vpop.f32.mrb[10].mxu1 }
 0x105   : > { %v365_v6 = vadd.f32 %v364_v4, %v218_v3  ;;  %v478_v7 = vadd.f32 %v477_v5, %v218_v3  ;;  %v366_v8 = vpop.f32.mrb[11].mxu0  ;;  %v479_v9 = vpop.f32.mrb[11].mxu1 }
 0x106   : > { %v367_v10 = vadd.f32 %v366_v8, %v218_v3  ;;  %v480_v11 = vadd.f32 %v479_v9, %v218_v3 }
 0x107   : > { %514 = vst [vmem:[%s908_s27 + $0xa0] sm:$0xff] %v365_v6  ;;  %516 = vst [vmem:[%s908_s27 + $0xb0] sm:$0xff] %v478_v7 }
 0x108   : > { %515 = vst [vmem:[%s908_s27 + $0xa8] sm:$0xff] %v367_v10  ;;  %517 = vst [vmem:[%s908_s27 + $0xb8] sm:$0xff] %v480_v11  ;;  %v370_v13 = vpop.f32.mrb[12].mxu0  ;;  %v483_v14 = vpop.f32.mrb[12].mxu1 }
 0x109   : > { %v371_v15 = vadd.f32 %v370_v13, %v223_v12  ;;  %v484_v16 = vadd.f32 %v483_v14, %v223_v12  ;;  %v372_v17 = vpop.f32.mrb[13].mxu0  ;;  %v485_v18 = vpop.f32.mrb[13].mxu1 }
 0x10a   : > { %v373_v19 = vadd.f32 %v372_v17, %v223_v12  ;;  %v486_v20 = vadd.f32 %v485_v18, %v223_v12 }
 0x10b   : > { %518 = vst [vmem:[%s908_s27 + $0xc0] sm:$0xff] %v371_v15  ;;  %520 = vst [vmem:[%s908_s27 + $0xd0] sm:$0xff] %v484_v16 }
 0x10c   : > { %519 = vst [vmem:[%s908_s27 + $0xc8] sm:$0xff] %v373_v19  ;;  %521 = vst [vmem:[%s908_s27 + $0xd8] sm:$0xff] %v486_v20  ;;  %v376_v22 = vpop.f32.mrb[14].mxu0  ;;  %v489_v23 = vpop.f32.mrb[14].mxu1 }
 0x10d   : > { %v377_v24 = vadd.f32 %v376_v22, %v228_v21  ;;  %v490_v25 = vadd.f32 %v489_v23, %v228_v21  ;;  %v378_v26 = vpop.f32.mrb[15].mxu0  ;;  %v491_v27 = vpop.f32.mrb[15].mxu1 }
 0x10e   : > { %v379_v28 = vadd.f32 %v378_v26, %v228_v21  ;;  %v492_v29 = vadd.f32 %v491_v27, %v228_v21 }
 0x10f   : > { %522 = vst [vmem:[%s908_s27 + $0xe0] sm:$0xff] %v377_v24  ;;  %524 = vst [vmem:[%s908_s27 + $0xf0] sm:$0xff] %v490_v25 }
 0x110   : > { %523 = vst [vmem:[%s908_s27 + $0xe8] sm:$0xff] %v379_v28  ;;  %525 = vst [vmem:[%s908_s27 + $0xf8] sm:$0xff] %v492_v29 }
 0x111   : > { %696 = shalt.err (!%p693_p3)
}
 0x112   : > { %s697_s10 = scalar_lea.hbm %s943_s16, 4096  ;;  %s701_s19 = scalar_lea.hbm %s997_s3, 8192 }
 0x113   : > { %p698_p4 = scmp.ne.s32.totalorder %s943_s16, %s697_s10  ;;  %p702_p9 = scmp.lt.u32.totalorder %s943_s16, %s997_s3 }
 0x114   : > { %p703_p10 = scmp.lt.u32.totalorder %s701_s19, %s697_s10  ;;  %p705_p12 = scmp.lt.u32.totalorder %s697_s10, %s943_s16 }
 0x115   : > { %p699_p7 = pnand %p698_p4, %p811_p5 }
 0x116   : > { %p704_p11 = por %p703_p10, %p702_p9 }
 0x117   : > { %p700_p8 = pneg %p699_p7 }
 0x118   : > { %p706_p13 = por %p705_p12, %p704_p11 }
 0x11a   : > { %p707_p0 = pnand %p706_p13, %p700_p8 }
 0x11c   : > { %710 = shalt.err (!%p707_p0)
}
 0x11d   : > { %s750_s25 = smov 512   ;;  %s751_s26 = smov 1024  }
 0x11e   : > { %s752_s27 = smov 32  }
 0x11f   : > { %635 = dma.vmem_to_hbm [thread:$0]  (%p811_p5), %s945_s29, 4096, %s943_s16, %s953_s5, %s750_s25, %s751_s26, %s752_s27  }
 0x120 PF: > { %p641_p1 = scmp.ge.s32.totalorder %s745_s15, 2  ;;  %s555_s28 = sand.u32 1, %s733_s12  }
 0x121   : > { %s556_s30 = scalar_lea.sflag [#allocation3], %s555_s28 }
 0x122   : > { %p638_p2 = pnand %p641_p1, %p815_p6 }
 0x124   : > { %728 = dma.done.wait (!%p638_p2), %s556_s30, 4096  }
 0x125   : > { %730 = vsyncadd (!%p638_p2), %s556_s30, 4294963200  ;;  %p13_p3 = scmp.ge.s32.totalorder %s798_s18, 4   ;;  %s1000_s12 = smov %s737_s13 }
 0x126   : > { %s1001_s13 = smov %s741_s14  ;;  %s1002_s14 = smov %s809_s21 }
 0x127   : > { %s1003_s15 = smov %s798_s18  ;;  %15 = sbr.rel (!%p13_p3) target bundleno = 3 (0x3), region = 67 }
 0x12e   :  { %561 = vsyncpa [#allocation3], 1 }
 0x12f   :  { %563 = vsyncpa [#allocation3 + $0x1], 1 }

</bundles_post_ra>
